<compile_context>
chip_gen: v6e
topology: v6e:2x2x1
jax: 0.10.0
libtpu: 0.0.40
codegen_flags: <defaults>
</compile_context>

<pallas_src>
import jax
import jax.numpy as jnp
from jax.experimental import pallas as pl
from jax.experimental.pallas import tpu as pltpu


def _drop_path_kernel(x_ref, scale_ref, o_ref):
    # (Bt, Tt) * (Bt, 1) row-broadcast multiply in f32, cast on store.
    x = x_ref[...].astype(jnp.float32)
    o_ref[...] = (x * scale_ref[...]).astype(o_ref.dtype)


def _choose_tiles(B, T, itemsize, target_bytes=2 << 20):
    # Lane (last) dim: keep it a multiple of 128 when possible, else full T.
    if T % 128 == 0:
        Tt = min(T, 4096)
    else:
        Tt = T
    # Sublane (batch) dim: multiples of 8 when possible, else full B.
    if B % 8 == 0:
        Bt = min(B, 64)
        while Bt > 8 and Bt * Tt * itemsize > target_bytes:
            Bt //= 2
    else:
        Bt = B
    return Bt, Tt


def drop_path(x, drop_prob, seed, training=True):
    """Pallas DropPath. x: (B, ...); the per-sample mask broadcasts over trailing dims."""
    drop_prob = float(drop_prob) if drop_prob is not None else 0.0
    if drop_prob <= 0.0 or not training:
        return x
    keep_prob = 1.0 - drop_prob

    B = x.shape[0]
    orig_shape = x.shape
    x2 = x.reshape(B, -1)          # lane-dense (B, T) layout
    T = x2.shape[1]

    # Per-sample keep/drop scale, computed once in the wrapper (f32).
    key = jax.random.PRNGKey(seed)
    u = jax.random.uniform(key, (B, 1), dtype=jnp.float32)
    scale = jnp.where(u < keep_prob, jnp.float32(1.0 / keep_prob), jnp.float32(0.0))

    Bt, Tt = _choose_tiles(B, T, x2.dtype.itemsize)
    grid = (pl.cdiv(B, Bt), pl.cdiv(T, Tt))

    out = pl.pallas_call(
        _drop_path_kernel,
        out_shape=jax.ShapeDtypeStruct((B, T), x.dtype),
        grid=grid,
        in_specs=[
            pl.BlockSpec((Bt, Tt), lambda i, j: (i, j)),
            pl.BlockSpec((Bt, 1), lambda i, j: (i, 0)),
        ],
        out_specs=pl.BlockSpec((Bt, Tt), lambda i, j: (i, j)),
        compiler_params=pltpu.CompilerParams(
            dimension_semantics=("parallel", "parallel"),
        ),
    )(x2, scale)
    return out.reshape(orig_shape)


if __name__ == "__main__":
    key = jax.random.PRNGKey(0)
    B, N, D = 2, 8, 32
    x = jax.random.normal(key, (B, N, D), dtype=jnp.float32)

    drop_prob = 0.5
    keep_prob = 1.0 - drop_prob

    # Training path (kernel runs).
    out = drop_path(x, drop_prob, seed=1234, training=True)
    out = jax.block_until_ready(out)

    # Each batch sample must be either all-zero or exactly x / keep_prob.
    ok = True
    for b in range(B):
        zeroed = bool(jnp.all(out[b] == 0.0))
        kept = bool(jnp.allclose(out[b], x[b] / keep_prob, rtol=1e-6, atol=1e-6))
        ok = ok and (zeroed or kept)

    # Eval / drop_prob == 0 path returns x unchanged.
    out_eval = jax.block_until_ready(drop_path(x, drop_prob, seed=1234, training=False))
    ok = ok and bool(jnp.array_equal(out_eval, x))
    out_p0 = jax.block_until_ready(drop_path(x, 0.0, seed=1234, training=True))
    ok = ok and bool(jnp.array_equal(out_p0, x))

    assert ok, "DropPath semantics check failed"
    print("KERNEL_OK")
</pallas_src>

<mosaic_0001>
module attributes {stable_mosaic.version = 11 : i64} {
  func.func @_drop_path_kernel(%arg0: i32, %arg1: i32, %arg2: memref<2x256xf32, #tpu.memory_space<vmem>>, %arg3: memref<2x1xf32, #tpu.memory_space<vmem>>, %arg4: memref<2x256xf32, #tpu.memory_space<vmem>>) attributes {dimension_semantics = [#tpu.dimension_semantics<parallel>, #tpu.dimension_semantics<parallel>], iteration_bounds = array<i64: 1, 1>, scalar_prefetch = 0 : i64, scratch_operands = 0 : i64, tpu.core_type = #tpu.core_type<tc>, window_params = [{transform_indices = @transform_0, window_bounds = array<i64: 2, 256>}, {transform_indices = @transform_1, window_bounds = array<i64: 2, 1>}, {transform_indices = @transform_2, window_bounds = array<i64: 2, 256>}]} {
    %c0 = arith.constant 0 : index
    %c0_0 = arith.constant 0 : index
    %0 = vector.load %arg2[%c0, %c0_0] : memref<2x256xf32, #tpu.memory_space<vmem>>, vector<2x256xf32>
    %c0_1 = arith.constant 0 : index
    %c0_2 = arith.constant 0 : index
    %1 = vector.load %arg3[%c0_1, %c0_2] : memref<2x1xf32, #tpu.memory_space<vmem>>, vector<2x1xf32>
    %2 = vector.broadcast %1 : vector<2x1xf32> to vector<2x256xf32>
    %3 = arith.mulf %0, %2 : vector<2x256xf32>
    %c0_3 = arith.constant 0 : index
    %c0_4 = arith.constant 0 : index
    %4 = vector.load %arg4[%c0_3, %c0_4] : memref<2x256xf32, #tpu.memory_space<vmem>>, vector<2x256xf32>
    tpu.vector_store %arg4[%c0_3, %c0_4], %3 {strides = array<i32>} : memref<2x256xf32, #tpu.memory_space<vmem>>, vector<2x256xf32>,
    return
  }
  func.func @transform_0(%arg0: i32, %arg1: i32) -> (i32, i32) {
    %c0_i32 = arith.constant 0 : i32
    return %arg0, %arg1 : i32, i32
  }
  func.func @transform_1(%arg0: i32, %arg1: i32) -> (i32, i32) {
    %c0_i32 = arith.constant 0 : i32
    %c0_i32_0 = arith.constant 0 : i32
    return %arg0, %c0_i32 : i32, i32
  }
  func.func @transform_2(%arg0: i32, %arg1: i32) -> (i32, i32) {
    %c0_i32 = arith.constant 0 : i32
    return %arg0, %arg1 : i32, i32
  }
}

</mosaic_0001>

<bundles_post_ra>
// kernel: tpu_custom_call.1
= control target key start
LH: loop header
LB: loop body
LE: loop exit
PB: predicated region body
PF: predicated region fallthrough
CT: control target
= control target key end

     0   :  { %7 = vsyncpa [#allocation3], 0  ;;  %s132_s0 = inlined_call_operand.hbm [shape: f32[2,256], index: 0, kind: input, shape index: {}]   ;;  %s133_s1 = inlined_call_operand.vmem [shape: f32[2,1], index: 1, kind: input, shape index: {}]   ;;  %s134_s2 = inlined_call_operand.hbm [shape: f32[2,256], index: 2, kind: output, shape index: {}]  }
   0x1   :  { %8 = vsyncpa [#allocation4], 0  ;;  %s104_s9 = smov [#allocation2]  }
   0x2   :  { %s15_s10 = sshll.u32 %s104_s9, 4  ;;  %s16_s10 = int_to_ptr.vmem [resolvable:$true] %s15_s10 }
   0x3   :  { %s68_s11 = scalar_lea.vmem %s16_s10, 64  ;;  %p73_p1 = scmp.lt.s32.totalorder %s16_s10, %s16_s10 }
   0x4   :  { %p69_p0 = scmp.ne.s32.totalorder %s16_s10, %s68_s11  ;;  %p74_p2 = scmp.lt.s32.totalorder %s68_s11, %s68_s11 }
   0x6   :  { %p75_p3 = por %p74_p2, %p73_p1 }
   0x8   :  { %p76_p4 = pnand %p75_p3, %p69_p0 }
   0xa   :  { %79 = shalt.err (!%p76_p4)
}
   0xb   :  { %18 = dma.hbm_to_vmem [thread:$0]  %s132_s0, 64, %s16_s10, [#allocation3]  }
   0xc   :  { %100 = dma.done.wait [#allocation3], 64  }
   0xd   :  { %101 = vsyncadd [#allocation3], 4294967232  ;;  %v105_v0 = vmov 0   ;;  %v25_v1 = vld [vmem:[%s133_s1] sm:$0x3]  ;;  %v33_v4 = vlaneseq  ;;  %s107_s16 = smov [#allocation5]  }
   0xe   :  { %59 = vset.pattern.permute.xlu0 %v105_v0  ;;  %v106_v2 = vmov 269488144   ;;  %v24_v9 = vld [vmem:[#allocation2] sm:$0xf]  ;;  %s46_s17 = sshll.u32 %s107_s16, 4  ;;  %s47_s17 = int_to_ptr.vmem [resolvable:$true] %s46_s17 }
   0xf   :  { %28 = vperm.xlu0 %59, %v25_v1   ;;  %v31_v3 = vunpack.c.l.s4 %v106_v2  ;;  %v34_v6 = vshrl.u32 %v33_v4, 7  ;;  %s80_s0 = scalar_lea.vmem %s47_s17, 64  ;;  %p85_p6 = scmp.lt.s32.totalorder %s47_s17, %s47_s17 }
  0x10   :  { %p81_p5 = scmp.ne.s32.totalorder %s47_s17, %s80_s0  ;;  %p86_p7 = scmp.lt.s32.totalorder %s80_s0, %s80_s0 }
  0x11   :  { %v32_v5 = vunpack.c.0.s8 %v31_v3 }
  0x12   :  { %p87_p8 = por %p86_p7, %p85_p6 }
  0x13   :  { %v35_v7 = vsub.s32 %v32_v5, %v34_v6 }
  0x14   :  { %p88_p9 = pnand %p87_p8, %p81_p5 }
  0x8a   :  { %v29_v8 = vpop.permute.xlu0 %28 }
  0x8b   :  { %v36_v10 = vrot.slane %v29_v8, %v35_v7 }
  0x8d   :  { %v38_v11 = vmul.f32 %v36_v10, %v24_v9 }
  0x8f   :  { %39 = vst [vmem:[#allocation5] sm:$0xf] %v38_v11 }
  0x90   :  { %91 = shalt.err (!%p88_p9)
}
  0x91   :  { %49 = dma.vmem_to_hbm [thread:$0]  %s47_s17, 64, %s134_s2, [#allocation4]  }
  0x92   :  { %102 = dma.done.wait [#allocation4], 64  }
  0x93   :  { %103 = vsyncadd [#allocation4], 4294967232 }
  0x94   :  { %53 = vsyncpa [#allocation3], 1 }
  0x95   :  { %54 = vsyncpa [#allocation4], 1 }

</bundles_post_ra>
